<compile_context>
chip_gen: v7x
topology: tpu7x:2x2x1
jax: 0.10.0
libtpu: 0.0.40
codegen_flags: <defaults>
</compile_context>

<pallas_src>
import math
import jax
import jax.numpy as jnp
from jax import lax
from jax.experimental import pallas as pl
from jax.experimental.pallas import tpu as pltpu

_INV_SQRT2 = 1.0 / math.sqrt(2.0)


def mlp_kernel(x_ref, wfc_ref, bfc_ref, wproj_ref, bproj_ref, o_ref):
    # grid = (row tiles, H tiles); axis 1 is the reduction over the hidden dim.
    j = pl.program_id(1)

    @pl.when(j == 0)
    def _init():
        # o_ref doubles as the f32 accumulator (its block index is constant
        # across j, so it stays resident).  Seed with the broadcast c_proj bias.
        o_ref[...] = jnp.broadcast_to(bproj_ref[...], o_ref.shape)

    # c_fc slice: cast the f32 x tile to bf16 in-register for the MXU.
    h = jnp.dot(x_ref[...].astype(wfc_ref.dtype), wfc_ref[...],
                preferred_element_type=jnp.float32)
    h = h + bfc_ref[...]

    # exact GELU: 0.5 * h * (1 + erf(h / sqrt(2)))  (elementwise -> exact per slice)
    g = 0.5 * h * (1.0 + lax.erf(h * _INV_SQRT2))

    # c_proj partial: (tm, th) @ (th, C), accumulated directly into the f32 output tile.
    o_ref[...] += jnp.dot(g.astype(wproj_ref.dtype), wproj_ref[...],
                          preferred_element_type=jnp.float32)


def _largest_divisor_tile(total, target, aligns):
    """Largest value <= target that divides `total` and is a multiple of one of
    `aligns` (tried in order); falls back to `total` itself."""
    target = max(1, min(target, total))
    if target == total:
        return total
    for align in aligns:
        cand = (target // align) * align
        while cand >= align:
            if total % cand == 0:
                return cand
            cand -= align
    return total


def mlp_pallas(x, w_fc, b_fc, w_proj, b_proj, *, tm=None, th=None,
               compute_dtype=jnp.bfloat16):
    """x: (M, C) f32. w_fc: (C, 4C), b_fc: (4C,), w_proj: (4C, C), b_proj: (C,).

    Weights should already be stored in `compute_dtype` (bf16); they are only
    cast here as a fallback.
    """
    M, C = x.shape
    H = w_fc.shape[1]
    isz = jnp.dtype(compute_dtype).itemsize
    x_isz = jnp.dtype(x.dtype).itemsize

    # Per-TensorCore VMEM capacity: 128 MiB on v5e/v6e, 64 MiB on v7x.
    try:
        vmem_cap = int(pltpu.get_tpu_info().vmem_capacity_bytes)
    except Exception:
        vmem_cap = 64 << 20  # conservative fallback (v7x)
    budget = max(vmem_cap - (8 << 20), 16 << 20)

    # --- hidden-dim tile th: keep weights fully resident when they fit --------
    if th is None:
        resident_bytes = 2 * (C * H + H * C) * isz + 2 * (H + C) * 4
        row_bytes_min = 2 * min(M, 256) * C * (x_isz + 4)   # x tile + f32 out tile
        if resident_bytes + row_bytes_min <= budget:
            th = H  # constant weight block indices -> fetched once, reused by all row tiles
        else:
            # th doesn't change HBM traffic; keep it modest (smaller on tight VMEM)
            # and spend the freed VMEM on a larger tm instead.
            th_target = 512 if budget >= (96 << 20) else 256
            th = _largest_divisor_tile(H, th_target, (256, 128))
    else:
        th = _largest_divisor_tile(H, th, (256, 128))

    # --- row tile tm: as large as the remaining VMEM budget allows (<= 1024) --
    if tm is None:
        fixed = 2 * (C * th + th * C) * isz + 2 * (th + C) * 4   # weight + bias buffers
        per_row = 2 * C * x_isz + 2 * C * 4                      # x tile + out/acc tile
        tm_cap = max(16, int((budget - fixed) // per_row))
        tm = min(1024, tm_cap)
    tm = _largest_divisor_tile(M, tm, (256, 16))

    assert M % tm == 0 and H % th == 0

    # Fallback casts only (params should already be stored in compute_dtype).
    wfc_c = w_fc if w_fc.dtype == compute_dtype else w_fc.astype(compute_dtype)
    wproj_c = w_proj if w_proj.dtype == compute_dtype else w_proj.astype(compute_dtype)
    bfc2 = b_fc.reshape(1, H).astype(jnp.float32)
    bproj2 = b_proj.reshape(1, C).astype(jnp.float32)

    # Explicit VMEM budget: double-buffered tiles + headroom, capped at capacity.
    vmem_bytes = (
        2 * tm * C * x_isz    # x row tile
        + 2 * C * th * isz    # W_fc slice
        + 2 * th * 4          # b_fc slice
        + 2 * th * C * isz    # W_proj slice
        + 2 * C * 4           # b_proj
        + 2 * tm * C * 4      # f32 output tile (doubles as accumulator)
    )
    vmem_limit = min(vmem_bytes + (8 << 20), vmem_cap)

    return pl.pallas_call(
        mlp_kernel,
        out_shape=jax.ShapeDtypeStruct((M, C), jnp.float32),
        grid_spec=pltpu.PrefetchScalarGridSpec(
            num_scalar_prefetch=0,
            grid=(M // tm, H // th),
            in_specs=[
                pl.BlockSpec((tm, C), lambda i, j: (i, 0)),   # x row tile (resident over j)
                pl.BlockSpec((C, th), lambda i, j: (0, j)),   # W_fc H-slice
                pl.BlockSpec((1, th), lambda i, j: (0, j)),   # b_fc H-slice
                pl.BlockSpec((th, C), lambda i, j: (j, 0)),   # W_proj H-slice
                pl.BlockSpec((1, C), lambda i, j: (0, 0)),    # b_proj
            ],
            out_specs=pl.BlockSpec((tm, C), lambda i, j: (i, 0)),
        ),
        compiler_params=pltpu.CompilerParams(
            dimension_semantics=("parallel", "arbitrary"),
            vmem_limit_bytes=vmem_limit,
        ),
    )(x, wfc_c, bfc2, wproj_c, bproj2)


def torch_linear_init(key, fan_in, fan_out):
    """Deterministic params matching nn.Linear's default init distribution."""
    kw, kb = jax.random.split(key)
    bound = 1.0 / math.sqrt(fan_in)
    # stored as (in, out) so the kernel does x @ W directly (PyTorch stores (out, in))
    w = jax.random.uniform(kw, (fan_in, fan_out), jnp.float32, -bound, bound)
    b = jax.random.uniform(kb, (fan_out,), jnp.float32, -bound, bound)
    return w, b


def mlp_reference(x, w_fc, b_fc, w_proj, b_proj):
    h = x @ w_fc + b_fc
    g = 0.5 * h * (1.0 + lax.erf(h / jnp.sqrt(2.0)))
    return g @ w_proj + b_proj


if __name__ == "__main__":
    # config: n_embd=32, bias=True, dropout=0.0 (inference)
    B, T, n_embd = 2, 8, 32
    hidden = 4 * n_embd

    key = jax.random.PRNGKey(0)
    kx, kfc, kproj = jax.random.split(key, 3)

    x = jax.random.normal(kx, (B, T, n_embd), jnp.float32)
    w_fc, b_fc = torch_linear_init(kfc, n_embd, hidden)
    w_proj, b_proj = torch_linear_init(kproj, hidden, n_embd)

    # Store weights in the MXU compute dtype ONCE at parameter creation
    # (not per forward call): avoids an extra HBM pass over both weight matrices.
    w_fc_c = w_fc.astype(jnp.bfloat16)
    w_proj_c = w_proj.astype(jnp.bfloat16)

    x2d = x.reshape(B * T, n_embd)
    out2d = mlp_pallas(x2d, w_fc_c, b_fc, w_proj_c, b_proj)
    out = out2d.reshape(B, T, n_embd)
    jax.block_until_ready(out)

    # f32 reference; looser tolerance because operands are fed to the MXU in bf16.
    ref = mlp_reference(x2d, w_fc, b_fc, w_proj, b_proj).reshape(B, T, n_embd)
    assert jnp.allclose(out, ref, atol=3e-2, rtol=3e-2), "mismatch vs reference"

    print("KERNEL_OK")
</pallas_src>

<mosaic_0001>
module attributes {stable_mosaic.version = 11 : i64} {
  func.func @mlp_kernel(%arg0: i32, %arg1: i32, %arg2: memref<16x32xf32, #tpu.memory_space<vmem>>, %arg3: memref<32x128xbf16, #tpu.memory_space<vmem>>, %arg4: memref<1x128xf32, #tpu.memory_space<vmem>>, %arg5: memref<128x32xbf16, #tpu.memory_space<vmem>>, %arg6: memref<1x32xf32, #tpu.memory_space<vmem>>, %arg7: memref<16x32xf32, #tpu.memory_space<vmem>>) attributes {dimension_semantics = [#tpu.dimension_semantics<parallel>, #tpu.dimension_semantics<arbitrary>], iteration_bounds = array<i64: 1, 1>, scalar_prefetch = 0 : i64, scratch_operands = 0 : i64, tpu.core_type = #tpu.core_type<tc>, window_params = [{transform_indices = @transform_0, window_bounds = array<i64: 16, 32>}, {transform_indices = @transform_1, window_bounds = array<i64: 32, 128>}, {transform_indices = @transform_2, window_bounds = array<i64: 1, 128>}, {transform_indices = @transform_3, window_bounds = array<i64: 128, 32>}, {pipeline_mode = #tpu.pipeline_mode<synchronous>, transform_indices = @transform_4, window_bounds = array<i64: 1, 32>}, {transform_indices = @transform_5, window_bounds = array<i64: 16, 32>}]} {
    %c0_i32 = arith.constant 0 : i32
    %0 = arith.cmpi eq, %arg1, %c0_i32 : i32
    %1 = arith.extui %0 : i1 to i32
    %c0_i32_0 = arith.constant 0 : i32
    %2 = arith.cmpi ne, %1, %c0_i32_0 : i32
    scf.if %2 {
      %c0_16 = arith.constant 0 : index
      %c0_17 = arith.constant 0 : index
      %24 = vector.load %arg6[%c0_16, %c0_17] : memref<1x32xf32, #tpu.memory_space<vmem>>, vector<1x32xf32>
      %25 = vector.shape_cast %24 : vector<1x32xf32> to vector<1x32xf32>
      %26 = vector.broadcast %25 : vector<1x32xf32> to vector<16x32xf32>
      %c0_18 = arith.constant 0 : index
      %c0_19 = arith.constant 0 : index
      %27 = vector.load %arg7[%c0_18, %c0_19] : memref<16x32xf32, #tpu.memory_space<vmem>>, vector<16x32xf32>
      tpu.vector_store %arg7[%c0_18, %c0_19], %26 {strides = array<i32>} : memref<16x32xf32, #tpu.memory_space<vmem>>, vector<16x32xf32>,
    } else {
    }
    %c0 = arith.constant 0 : index
    %c0_1 = arith.constant 0 : index
    %3 = vector.load %arg2[%c0, %c0_1] : memref<16x32xf32, #tpu.memory_space<vmem>>, vector<16x32xf32>
    %4 = arith.truncf %3 : vector<16x32xf32> to vector<16x32xbf16>
    %c0_2 = arith.constant 0 : index
    %c0_3 = arith.constant 0 : index
    %5 = vector.load %arg3[%c0_2, %c0_3] : memref<32x128xbf16, #tpu.memory_space<vmem>>, vector<32x128xbf16>
    %cst = arith.constant dense<0.000000e+00> : vector<16x128xf32>
    %6 = tpu.matmul %4, %5, %cst {dimension_numbers = #tpu.dot_dimension_numbers<[1], [0], [0], [1], [0, 0, 1, 1], [], []>} : vector<16x32xbf16>, vector<32x128xbf16>, vector<16x128xf32> -> vector<16x128xf32>
    %c0_4 = arith.constant 0 : index
    %c0_5 = arith.constant 0 : index
    %7 = vector.load %arg4[%c0_4, %c0_5] : memref<1x128xf32, #tpu.memory_space<vmem>>, vector<1x128xf32>
    %8 = vector.broadcast %7 : vector<1x128xf32> to vector<16x128xf32>
    %9 = arith.addf %6, %8 : vector<16x128xf32>
    %cst_6 = arith.constant 5.000000e-01 : f32
    %10 = vector.broadcast %cst_6 : f32 to vector<16x128xf32>
    %11 = arith.mulf %10, %9 : vector<16x128xf32>
    %cst_7 = arith.constant 0.707106769 : f32
    %12 = vector.broadcast %cst_7 : f32 to vector<16x128xf32>
    %13 = arith.mulf %9, %12 : vector<16x128xf32>
    %14 = math.erf %13 : vector<16x128xf32>
    %cst_8 = arith.constant 1.000000e+00 : f32
    %15 = vector.broadcast %cst_8 : f32 to vector<16x128xf32>
    %16 = arith.addf %15, %14 : vector<16x128xf32>
    %17 = arith.mulf %11, %16 : vector<16x128xf32>
    %c0_9 = arith.constant 0 : index
    %c0_10 = arith.constant 0 : index
    %18 = vector.load %arg7[%c0_9, %c0_10] : memref<16x32xf32, #tpu.memory_space<vmem>>, vector<16x32xf32>
    %19 = arith.truncf %17 : vector<16x128xf32> to vector<16x128xbf16>
    %c0_11 = arith.constant 0 : index
    %c0_12 = arith.constant 0 : index
    %20 = vector.load %arg5[%c0_11, %c0_12] : memref<128x32xbf16, #tpu.memory_space<vmem>>, vector<128x32xbf16>
    %cst_13 = arith.constant dense<0.000000e+00> : vector<16x32xf32>
    %21 = tpu.matmul %19, %20, %cst_13 {dimension_numbers = #tpu.dot_dimension_numbers<[1], [0], [0], [1], [0, 0, 1, 1], [], []>} : vector<16x128xbf16>, vector<128x32xbf16>, vector<16x32xf32> -> vector<16x32xf32>
    %22 = arith.addf %18, %21 : vector<16x32xf32>
    %c0_14 = arith.constant 0 : index
    %c0_15 = arith.constant 0 : index
    %23 = vector.load %arg7[%c0_14, %c0_15] : memref<16x32xf32, #tpu.memory_space<vmem>>, vector<16x32xf32>
    tpu.vector_store %arg7[%c0_14, %c0_15], %22 {strides = array<i32>} : memref<16x32xf32, #tpu.memory_space<vmem>>, vector<16x32xf32>,
    return
  }
  func.func @transform_0(%arg0: i32, %arg1: i32) -> (i32, i32) {
    %c0_i32 = arith.constant 0 : i32
    %c0_i32_0 = arith.constant 0 : i32
    return %arg0, %c0_i32 : i32, i32
  }
  func.func @transform_1(%arg0: i32, %arg1: i32) -> (i32, i32) {
    %c0_i32 = arith.constant 0 : i32
    %c0_i32_0 = arith.constant 0 : i32
    return %c0_i32, %arg1 : i32, i32
  }
  func.func @transform_2(%arg0: i32, %arg1: i32) -> (i32, i32) {
    %c0_i32 = arith.constant 0 : i32
    %c0_i32_0 = arith.constant 0 : i32
    return %c0_i32, %arg1 : i32, i32
  }
  func.func @transform_3(%arg0: i32, %arg1: i32) -> (i32, i32) {
    %c0_i32 = arith.constant 0 : i32
    %c0_i32_0 = arith.constant 0 : i32
    return %arg1, %c0_i32 : i32, i32
  }
  func.func @transform_4(%arg0: i32, %arg1: i32) -> (i32, i32) {
    %c0_i32 = arith.constant 0 : i32
    %c0_i32_0 = arith.constant 0 : i32
    %c0_i32_1 = arith.constant 0 : i32
    return %c0_i32, %c0_i32_0 : i32, i32
  }
  func.func @transform_5(%arg0: i32, %arg1: i32) -> (i32, i32) {
    %c0_i32 = arith.constant 0 : i32
    %c0_i32_0 = arith.constant 0 : i32
    return %arg0, %c0_i32 : i32, i32
  }
}

</mosaic_0001>

<bundles_post_ra>
// kernel: tpu_custom_call.1
= control target key start
LH: loop header
LB: loop body
LE: loop exit
PB: predicated region body
PF: predicated region fallthrough
CT: control target
= control target key end

     0   :  { %v341_v1 = vmov 0.0   ;;  %vm342_vm0 = vmmov 0   ;;  %vm33_vm1 = vcmask 261120   ;;  %s435_s0 = inlined_call_operand.vmem [shape: f32[16,32], index: 0, kind: input, shape index: {}]   ;;  %s436_s1 = inlined_call_operand.vmem [shape: bf16[32,128], index: 1, kind: input, shape index: {}]   ;;  %s437_s2 = inlined_call_operand.vmem [shape: f32[1,128], index: 2, kind: input, shape index: {}]   ;;  %s438_s3 = inlined_call_operand.vmem [shape: bf16[128,32], index: 3, kind: input, shape index: {}]   ;;  %s439_s4 = inlined_call_operand.vmem [shape: f32[1,32], index: 4, kind: input, shape index: {}]   ;;  %s440_s5 = inlined_call_operand.hbm [shape: f32[16,32], index: 5, kind: output, shape index: {}]  }
   0x1   :  { %v303_v0 = vld [vmem:[%s436_s1] sm:$0xff]   ;;  %270 = vmatprep.subr.bf16.mxu0 %v341_v1  ;;  %v304_v2 = vld [vmem:[%s436_s1 + $0x8] sm:$0xff]   ;;  %278 = vmatprep.subr.bf16.mxu1 %v341_v1 }
   0x2   :  { %271 = vmatpush3.bf16.msra.mxu0 %v303_v0  ;;  %274 = vmatprep.mubr.msk.bf16.mxu0 %vm342_vm0, %v341_v1  ;;  %v36_v3 = vld [vmem:[%s435_s0] sm:$0xff]  ;;  %v37_v4 = vld [vmem:[%s435_s0 + $0x8] sm:$0xff] }
   0x3   :  { %272 = vmatprep.subr.bf16.mxu0 %v341_v1  ;;  %v305_v5 = vld [vmem:[%s438_s3] sm:$0xff]   ;;  %294 = vmatprep.mubr.msk.bf16.mxu1 %vm342_vm0, %v341_v1  ;;  %v306_v6 = vld [vmem:[%s438_s3 + $0x8] sm:$0xff]   ;;  %v38_v7 = vpack.c.bf16 %v37_v4, %v36_v3 }
   0x4   :  { %279 = vmatpush3.bf16.msra.mxu1 %v305_v5 }
   0x5   :  { %280 = vmatprep.subr.bf16.mxu1 %v341_v1 }
   0x6   :  { %273 = vmatpush3.bf16.msra.mxu0 %v304_v2 }
   0x8   :  { %281 = vmatpush3.bf16.msra.mxu1 %v306_v6 }
   0x9   :  { %275 = vmatmul.mubr.msk.bf16.vlgmr.msra.gmra.mrb[0].mxu0 %vm33_vm1, %v38_v7 }
   0xa   :  { %10 = vsyncpa [#allocation3], 0  ;;  %282 = vmatprep.subr.bf16.mxu1 %v341_v1  ;;  %v307_v8 = vld [vmem:[%s438_s3 + $0x10] sm:$0xff]   ;;  %v308_v9 = vld [vmem:[%s438_s3 + $0x18] sm:$0xff]  }
   0xb   :  { %v309_v10 = vld [vmem:[%s438_s3 + $0x20] sm:$0xff]   ;;  %v310_v11 = vld [vmem:[%s438_s3 + $0x28] sm:$0xff]   ;;  %v311_v12 = vld [vmem:[%s438_s3 + $0x30] sm:$0xff]  }
   0xc   :  { %283 = vmatpush3.bf16.msra.mxu1 %v307_v8  ;;  %v312_v13 = vld [vmem:[%s438_s3 + $0x38] sm:$0xff]   ;;  %v245_v14 = vld [vmem:[%s439_s4] ss:$0 sm:$0xff] }
   0xd   :  { %284 = vmatprep.subr.bf16.mxu1 %v341_v1  ;;  %34 = vst.msk [vmem:[#allocation2] sm:$0xff] %vm33_vm1, %v245_v14  ;;  %35 = vst.msk [vmem:[#allocation2 + $0x8] sm:$0xff] %vm33_vm1, %v245_v14  ;;  %v246_v15 = vld [vmem:[%s437_s2] ss:$0 sm:$0xff]  ;;  %s343_s2 = smov [#allocation2]  }
   0xe   :  { %s234_s3 = sshll.u32 %s343_s2, 4  ;;  %s235_s3 = int_to_ptr.vmem [resolvable:$true] %s234_s3 }
   0xf   :  { %s317_s4 = scalar_lea.vmem %s235_s3, 256  ;;  %p322_p1 = scmp.lt.s32.totalorder %s235_s3, %s235_s3 }
  0x10   :  { %285 = vmatpush3.bf16.msra.mxu1 %v308_v9  ;;  %p318_p0 = scmp.ne.s32.totalorder %s235_s3, %s317_s4  ;;  %p323_p2 = scmp.lt.s32.totalorder %s317_s4, %s317_s4 }
  0x11   :  { %286 = vmatprep.subr.bf16.mxu1 %v341_v1 }
  0x12   :  { %p324_p3 = por %p323_p2, %p322_p1 }
  0x14   :  { %287 = vmatpush3.bf16.msra.mxu1 %v309_v10  ;;  %v117_v33 = vld [vmem:[#allocation2] sm:$0xff]  ;;  %v118_v35 = vld [vmem:[#allocation2 + $0x8] sm:$0xff]  ;;  %p325_p4 = pnand %p324_p3, %p318_p0 }
  0x15   :  { %288 = vmatprep.subr.bf16.mxu1 %v341_v1 }
  0x18   :  { %289 = vmatpush3.bf16.msra.mxu1 %v310_v11 }
  0x19   :  { %290 = vmatprep.subr.bf16.mxu1 %v341_v1 }
  0x1c   :  { %291 = vmatpush3.bf16.msra.mxu1 %v311_v12 }
  0x1d   :  { %292 = vmatprep.subr.bf16.mxu1 %v341_v1 }
  0x20   :  { %293 = vmatpush3.bf16.msra.mxu1 %v312_v13 }
  0xdc   :  { %v100_v16 = vpop.f32.mrb[0].mxu0 }
  0xdd   :  { %v101_v17 = vadd.f32 %v246_v15, %v100_v16  ;;  %v276_v18 = vpop.f32.mrb[1].mxu0 }
  0xde   :  { %v103_v19 = vpop.f32.mrb[2].mxu0 }
  0xdf   :  { %v109_v20 = vmul.f32 0.70710677, %v101_v17  ;;  %v104_v21 = vadd.f32 %v246_v15, %v103_v19  ;;  %v277_v22 = vpop.f32.mrb[3].mxu0  ;;  %v107_v27 = vmul.f32 0.5, %v101_v17 }
  0xe1   :  { %313 = verf.f32 %v109_v20  ;;  %v110_v23 = vmul.f32 0.70710677, %v104_v21  ;;  %v108_v28 = vmul.f32 0.5, %v104_v21 }
  0xe3   :  { %315 = verf.f32 %v110_v23 }
  0xeb   :  { %v314_v24 = vpop.eup %313 }
  0xec   :  { %v113_v25 = vadd.f32 1.0, %v314_v24 }
  0xed   :  { %v316_v26 = vpop.eup %315 }
  0xee   :  { %v114_v29 = vadd.f32 1.0, %v316_v26  ;;  %v115_v30 = vmul.f32 %v113_v25, %v107_v27 }
  0xf0   :  { %v116_v31 = vmul.f32 %v114_v29, %v108_v28 }
  0xf2   :  { %v119_v32 = vpack.c.bf16 %v116_v31, %v115_v30 }
  0xf4   :  { %295 = vmatmul.mubr.bf16.vlgmr.msra.gmra.mrb[0].mxu1 %v119_v32 }
 0x1c7   :  { %v218_v34 = vpop.f32.mrb[0].mxu1 }
 0x1c8   :  { %v225_v36 = vadd.f32 %v218_v34, %v117_v33  ;;  %v296_v37 = vpop.f32.mrb[1].mxu1 }
 0x1c9   :  { %v221_v38 = vpop.f32.mrb[2].mxu1 }
 0x1ca   :  { %227 = vst.msk [vmem:[#allocation2] sm:$0xff] %vm33_vm1, %v225_v36  ;;  %v226_v39 = vadd.f32 %v221_v38, %v118_v35  ;;  %v297_v40 = vpop.f32.mrb[3].mxu1 }
 0x1cc   :  { %228 = vst.msk [vmem:[#allocation2 + $0x8] sm:$0xff] %vm33_vm1, %v226_v39 }
 0x1cd   :  { %328 = shalt.err (!%p325_p4)
}
 0x1ce   :  { %s329_s21 = scalar_lea.hbm %s440_s5, 256 }
 0x1cf   :  { %p330_p5 = scmp.ne.s32.totalorder %s440_s5, %s329_s21  ;;  %p333_p6 = scmp.lt.u32.totalorder %s329_s21, %s440_s5 }
 0x1d1   :  { %p335_p7 = pnand %p333_p6, %p330_p5 }
 0x1d3   :  { %338 = shalt.err (!%p335_p7)
}
 0x1d4   :  { %s344_s26 = smov 128   ;;  %s345_s27 = smov 8  }
 0x1d5   :  { %240 = dma.vmem_to_hbm [thread:$0]  %s235_s3, 256, %s440_s5, [#allocation3], %s344_s26, %s344_s26, %s345_s27  }
 0x1d6   :  { %339 = dma.done.wait [#allocation3], 256  }
 0x1d7   :  { %340 = vsyncadd [#allocation3], 4294967040 }
 0x1d8   :  { %244 = vsyncpa [#allocation3], 1 }

</bundles_post_ra>
